<compile_context>
chip_gen: v5e
topology: v5e:2x2
jax: 0.10.0
libtpu: 0.0.40
codegen_flags: <defaults>
</compile_context>

<pallas_src>
import jax
import jax.numpy as jnp
from jax import lax
from jax.experimental import pallas as pl
from jax.experimental.pallas import tpu as pltpu

_LANES = 128
_SUBLANES = 8


def _cdiv(a, b):
    return -(-a // b)


def _round_up(n, m):
    return _cdiv(n, m) * m


def _energy_kernel(x_ref, w_ref, b_ref, o_ref):
    """One batch tile of y = x @ W.T + b for nn.Linear(F, 1).

    x_ref: (R, L) VMEM -- L = G*F lanes; G original rows packed per folded row.
    w_ref: (1, L) VMEM -- weight row, tiled G times along lanes.
    b_ref: (1, 1) SMEM -- scalar bias.
    o_ref: (R, G) VMEM -- o[r, g] = <x[r*G + g, :], W> + b
    """
    R, L = x_ref.shape
    G = o_ref.shape[-1]
    F = L // G
    # Full-lane-width VPU multiply with f32 accumulation (x streams in native dtype).
    prod = x_ref[...].astype(jnp.float32) * w_ref[...].astype(jnp.float32)
    lane = lax.broadcasted_iota(jnp.int32, (1, G), dimension=1)
    s = jnp.zeros((R, G), jnp.float32)
    for g in range(G):  # static unroll, G in {1, 2, 4, 8, 16}
        # Segmented lane reduce (XLU) for the g-th packed original row of each folded row.
        seg = jnp.sum(prod[:, g * F:(g + 1) * F], axis=-1, keepdims=True)
        s = jnp.where(lane == g, seg, s)
    # TODO(synk): a joint shifted-add (pltpu.roll) reduction over all segments at once would
    # cut the VPU/XLU work ~G-fold and sit at HBM roofline on v6e/v7x.
    o_ref[...] = (s + b_ref[0, 0]).astype(o_ref.dtype)


def test_energy_model_forward(x, weight, bias, *, target_tile_bytes=8 << 20):
    """Pallas equivalent of TestEnergyModel.forward.

    x:      (batch, F)
    weight: (1, F)   -- torch nn.Linear weight layout (out, in)
    bias:   (1,)     -- torch nn.Linear bias
    returns (batch, 1) in x.dtype
    """
    B, F = x.shape
    assert weight.shape == (1, F)
    assert bias.shape == (1,)
    out_dtype = x.dtype
    itemsize = jnp.dtype(x.dtype).itemsize

    # Fold small feature dims into full 128-lane rows (free contiguous reshape).
    if F <= _LANES and _LANES % F == 0 and F >= _SUBLANES:
        G = _LANES // F
    else:
        G = 1  # TODO(synk): lane-fold feature dims that don't divide 128 by padding F.
    L = G * F

    rows_needed = _cdiv(B, G)
    row_bytes = L * itemsize

    # Rows per tile from a byte budget so DMA time dominates the ~0.35us per-step overhead.
    block_rows = max(_SUBLANES, (target_tile_bytes // row_bytes) // _SUBLANES * _SUBLANES)
    if rows_needed >= 4 * _SUBLANES:
        # Keep >= 4 grid steps so the "parallel" axis can split across TensorCores (v7x).
        block_rows = min(block_rows, _round_up(_cdiv(rows_needed, 4), _SUBLANES))
    block_rows = min(block_rows, _round_up(rows_needed, _SUBLANES))

    num_tiles = _cdiv(rows_needed, block_rows)
    rows_pad = num_tiles * block_rows
    b_pad = rows_pad * G

    if b_pad != B:
        # Ragged batch: pad up to whole tiles (padded rows are sliced away below).
        x = jnp.pad(x, ((0, b_pad - B), (0, 0)))
    x_fold = x.reshape(rows_pad, L)                       # contiguous view, no copy
    w_row = jnp.tile(weight, (1, G)) if G > 1 else weight  # (1, L)
    bias_sm = bias.reshape(1, 1).astype(jnp.float32)

    # Double-buffered x tile + out tile must fit the scoped VMEM limit on every generation
    # (v5e default is only 16 MiB); stay well under v7x's 64 MiB physical VMEM.
    x_tile_bytes = block_rows * L * itemsize
    out_tile_bytes = block_rows * G * jnp.dtype(out_dtype).itemsize
    vmem_limit = int(min(max(3 * (x_tile_bytes + out_tile_bytes), 16 << 20), 40 << 20))

    out = pl.pallas_call(
        _energy_kernel,
        out_shape=jax.ShapeDtypeStruct((rows_pad, G), out_dtype),
        grid=(num_tiles,),
        in_specs=[
            # TODO(synk): pipeline_mode=pl.Buffered(3) here if input DMA is still exposed on v7x.
            pl.BlockSpec((block_rows, L), lambda i: (i, 0)),       # stream x tiles
            pl.BlockSpec((1, L), lambda i: (0, 0)),                # weight stays resident
            pl.BlockSpec(memory_space=pltpu.MemorySpace.SMEM),     # scalar bias
        ],
        out_specs=pl.BlockSpec((block_rows, G), lambda i: (i, 0)),
        compiler_params=pltpu.CompilerParams(
            dimension_semantics=("parallel",),
            vmem_limit_bytes=vmem_limit,
        ),
    )(x_fold, w_row, bias_sm)

    return out.reshape(b_pad, 1)[:B]


if __name__ == "__main__":
    key = jax.random.PRNGKey(0)
    k_w, k_b, k1, k2, k3, k4 = jax.random.split(key, 6)

    F = 32
    bound = 1.0 / (F ** 0.5)  # nn.Linear init range
    weight = jax.random.uniform(k_w, (1, F), jnp.float32, minval=-bound, maxval=bound)
    bias = jax.random.uniform(k_b, (1,), jnp.float32, minval=-bound, maxval=bound)

    def ref(x, w, b):
        return jnp.dot(x.astype(jnp.float32), w.astype(jnp.float32).T,
                       precision=lax.Precision.HIGHEST) + b.astype(jnp.float32)

    # 1) Small batch (single tile, batch padded 8 -> 32 rows internally).
    x = jax.random.normal(k1, (8, F), jnp.float32)
    out = test_energy_model_forward(x, weight, bias)
    jax.block_until_ready(out)
    assert out.shape == (8, 1)
    assert jnp.allclose(out, ref(x, weight, bias), atol=1e-5, rtol=1e-5)

    # 2) Ragged larger batch (multi-tile "parallel" grid + tail padding).
    x = jax.random.normal(k2, (1000, F), jnp.float32)
    out = test_energy_model_forward(x, weight, bias)
    jax.block_until_ready(out)
    assert out.shape == (1000, 1)
    assert jnp.allclose(out, ref(x, weight, bias), atol=1e-5, rtol=1e-5)

    # 3) bf16 activations stream in native dtype (f32 accumulate happens in-kernel).
    xb = jax.random.normal(k3, (512, F), jnp.float32).astype(jnp.bfloat16)
    outb = test_energy_model_forward(xb, weight, bias)
    jax.block_until_ready(outb)
    assert outb.shape == (512, 1)
    assert jnp.allclose(outb.astype(jnp.float32), ref(xb, weight, bias), atol=3e-2, rtol=3e-2)

    # 4) Wide feature dim (no lane folding, G == 1 path).
    F2 = 256
    w2 = jax.random.uniform(k_w, (1, F2), jnp.float32, minval=-bound, maxval=bound)
    x2 = jax.random.normal(k4, (384, F2), jnp.float32)
    out2 = test_energy_model_forward(x2, w2, bias)
    jax.block_until_ready(out2)
    assert out2.shape == (384, 1)
    assert jnp.allclose(out2, ref(x2, w2, bias), atol=1e-4, rtol=1e-4)

    print("KERNEL_OK")
</pallas_src>

<mosaic_0001>
module attributes {stable_mosaic.version = 11 : i64} {
  func.func @_energy_kernel(%arg0: i32, %arg1: memref<8x128xf32, #tpu.memory_space<vmem>>, %arg2: memref<1x128xf32, #tpu.memory_space<vmem>>, %arg3: memref<1x1xf32, #tpu.memory_space<smem>>, %arg4: memref<8x4xf32, #tpu.memory_space<vmem>>) attributes {dimension_semantics = [#tpu.dimension_semantics<parallel>], iteration_bounds = array<i64: 1>, scalar_prefetch = 0 : i64, scratch_operands = 0 : i64, tpu.core_type = #tpu.core_type<tc>, window_params = [{transform_indices = @transform_0, window_bounds = array<i64: 8, 128>}, {pipeline_mode = #tpu.pipeline_mode<synchronous>, transform_indices = @transform_1, window_bounds = array<i64: 1, 128>}, {transform_indices = @transform_2, window_bounds = array<i64: 1, 1>}, {transform_indices = @transform_3, window_bounds = array<i64: 8, 4>}]} {
    %c0 = arith.constant 0 : index
    %c0_0 = arith.constant 0 : index
    %0 = vector.load %arg1[%c0, %c0_0] : memref<8x128xf32, #tpu.memory_space<vmem>>, vector<8x128xf32>
    %c0_1 = arith.constant 0 : index
    %c0_2 = arith.constant 0 : index
    %1 = vector.load %arg2[%c0_1, %c0_2] : memref<1x128xf32, #tpu.memory_space<vmem>>, vector<1x128xf32>
    %2 = vector.broadcast %1 : vector<1x128xf32> to vector<8x128xf32>
    %3 = arith.mulf %0, %2 : vector<8x128xf32>
    %4 = tpu.iota {dimensions = array<i32: 1>} : vector<1x4xi32>
    %cst = arith.constant 0.000000e+00 : f32
    %5 = vector.broadcast %cst : f32 to vector<8x4xf32>
    %6 = vector.extract_strided_slice %3 {offsets = [0, 0], sizes = [8, 32], strides = [1, 1]} : vector<8x128xf32> to vector<8x32xf32>
    %cst_3 = arith.constant dense<0.000000e+00> : vector<8xf32>
    %7 = vector.multi_reduction <add>, %6, %cst_3 [1] : vector<8x32xf32> to vector<8xf32>
    %8 = vector.shape_cast %7 : vector<8xf32> to vector<8x1xf32>
    %c0_i32 = arith.constant 0 : i32
    %9 = vector.broadcast %c0_i32 : i32 to vector<1x4xi32>
    %10 = arith.cmpi eq, %4, %9 : vector<1x4xi32>
    %11 = vector.shape_cast %10 : vector<1x4xi1> to vector<1x4xi1>
    %12 = vector.broadcast %11 : vector<1x4xi1> to vector<8x4xi1>
    %13 = vector.shape_cast %8 : vector<8x1xf32> to vector<8x1xf32>
    %14 = vector.broadcast %13 : vector<8x1xf32> to vector<8x4xf32>
    %15 = arith.select %12, %14, %5 : vector<8x4xi1>, vector<8x4xf32>
    %16 = vector.extract_strided_slice %3 {offsets = [0, 32], sizes = [8, 32], strides = [1, 1]} : vector<8x128xf32> to vector<8x32xf32>
    %cst_4 = arith.constant dense<0.000000e+00> : vector<8xf32>
    %17 = vector.multi_reduction <add>, %16, %cst_4 [1] : vector<8x32xf32> to vector<8xf32>
    %18 = vector.shape_cast %17 : vector<8xf32> to vector<8x1xf32>
    %c1_i32 = arith.constant 1 : i32
    %19 = vector.broadcast %c1_i32 : i32 to vector<1x4xi32>
    %20 = arith.cmpi eq, %4, %19 : vector<1x4xi32>
    %21 = vector.shape_cast %20 : vector<1x4xi1> to vector<1x4xi1>
    %22 = vector.broadcast %21 : vector<1x4xi1> to vector<8x4xi1>
    %23 = vector.shape_cast %18 : vector<8x1xf32> to vector<8x1xf32>
    %24 = vector.broadcast %23 : vector<8x1xf32> to vector<8x4xf32>
    %25 = arith.select %22, %24, %15 : vector<8x4xi1>, vector<8x4xf32>
    %26 = vector.extract_strided_slice %3 {offsets = [0, 64], sizes = [8, 32], strides = [1, 1]} : vector<8x128xf32> to vector<8x32xf32>
    %cst_5 = arith.constant dense<0.000000e+00> : vector<8xf32>
    %27 = vector.multi_reduction <add>, %26, %cst_5 [1] : vector<8x32xf32> to vector<8xf32>
    %28 = vector.shape_cast %27 : vector<8xf32> to vector<8x1xf32>
    %c2_i32 = arith.constant 2 : i32
    %29 = vector.broadcast %c2_i32 : i32 to vector<1x4xi32>
    %30 = arith.cmpi eq, %4, %29 : vector<1x4xi32>
    %31 = vector.shape_cast %30 : vector<1x4xi1> to vector<1x4xi1>
    %32 = vector.broadcast %31 : vector<1x4xi1> to vector<8x4xi1>
    %33 = vector.shape_cast %28 : vector<8x1xf32> to vector<8x1xf32>
    %34 = vector.broadcast %33 : vector<8x1xf32> to vector<8x4xf32>
    %35 = arith.select %32, %34, %25 : vector<8x4xi1>, vector<8x4xf32>
    %36 = vector.extract_strided_slice %3 {offsets = [0, 96], sizes = [8, 32], strides = [1, 1]} : vector<8x128xf32> to vector<8x32xf32>
    %cst_6 = arith.constant dense<0.000000e+00> : vector<8xf32>
    %37 = vector.multi_reduction <add>, %36, %cst_6 [1] : vector<8x32xf32> to vector<8xf32>
    %38 = vector.shape_cast %37 : vector<8xf32> to vector<8x1xf32>
    %c3_i32 = arith.constant 3 : i32
    %39 = vector.broadcast %c3_i32 : i32 to vector<1x4xi32>
    %40 = arith.cmpi eq, %4, %39 : vector<1x4xi32>
    %41 = vector.shape_cast %40 : vector<1x4xi1> to vector<1x4xi1>
    %42 = vector.broadcast %41 : vector<1x4xi1> to vector<8x4xi1>
    %43 = vector.shape_cast %38 : vector<8x1xf32> to vector<8x1xf32>
    %44 = vector.broadcast %43 : vector<8x1xf32> to vector<8x4xf32>
    %45 = arith.select %42, %44, %35 : vector<8x4xi1>, vector<8x4xf32>
    %c0_7 = arith.constant 0 : index
    %c0_8 = arith.constant 0 : index
    %46 = memref.load %arg3[%c0_7, %c0_8] : memref<1x1xf32, #tpu.memory_space<smem>>
    %47 = vector.broadcast %46 : f32 to vector<8x4xf32>
    %48 = arith.addf %45, %47 : vector<8x4xf32>
    %c0_9 = arith.constant 0 : index
    %c0_10 = arith.constant 0 : index
    %49 = vector.load %arg4[%c0_9, %c0_10] : memref<8x4xf32, #tpu.memory_space<vmem>>, vector<8x4xf32>
    tpu.vector_store %arg4[%c0_9, %c0_10], %48 {strides = array<i32>} : memref<8x4xf32, #tpu.memory_space<vmem>>, vector<8x4xf32>,
    return
  }
  func.func @transform_0(%arg0: i32) -> (i32, i32) {
    %c0_i32 = arith.constant 0 : i32
    %c0_i32_0 = arith.constant 0 : i32
    return %arg0, %c0_i32 : i32, i32
  }
  func.func @transform_1(%arg0: i32) -> (i32, i32) {
    %c0_i32 = arith.constant 0 : i32
    %c0_i32_0 = arith.constant 0 : i32
    %c0_i32_1 = arith.constant 0 : i32
    return %c0_i32, %c0_i32_0 : i32, i32
  }
  func.func @transform_2(%arg0: i32) -> (i32, i32) {
    %c0_i32 = arith.constant 0 : i32
    %c0_i32_0 = arith.constant 0 : i32
    %c0_i32_1 = arith.constant 0 : i32
    return %c0_i32, %c0_i32_0 : i32, i32
  }
  func.func @transform_3(%arg0: i32) -> (i32, i32) {
    %c0_i32 = arith.constant 0 : i32
    %c0_i32_0 = arith.constant 0 : i32
    return %arg0, %c0_i32 : i32, i32
  }
}

</mosaic_0001>

<bundles_post_ra>
// kernel: tpu_custom_call.1
= control target key start
LH: loop header
LB: loop body
LE: loop exit
PB: predicated region body
PF: predicated region fallthrough
CT: control target
= control target key end

     0   :  { %9 = vsyncpa [#allocation4], 0  ;;  %s117_s15 = smov [#allocation3]   ;;  %s153_s0 = inlined_call_operand.hbm [shape: f32[8,128], index: 0, kind: input, shape index: {}]   ;;  %s154_s1 = inlined_call_operand.vmem [shape: f32[1,128], index: 1, kind: input, shape index: {}]   ;;  %s155_s2 = inlined_call_operand.<no memory space> [shape: f32[1,1], index: 2, kind: input, shape index: {}]   ;;  %s156_s3 = inlined_call_operand.vmem [shape: f32[8,4], index: 3, kind: output, shape index: {}]  }
   0x1   :  { %s15_s14 = sshll.u32 %s153_s0, 4  ;;  %s17_s16 = sshll.u32 %s117_s15, 4  ;;  %s16_s14 = int_to_ptr.hbm [resolvable:$true] %s15_s14  ;;  %s18_s16 = int_to_ptr.vmem [resolvable:$true] %s17_s16 }
   0x2   :  { %20 = dma.hbm_to_vmem [thread:$0]  %s16_s14, 128, %s18_s16, [#allocation4]  }
   0x3   :  { %115 = dma.done.wait [#allocation4], 128  }
   0x4   :  { %116 = vsyncadd [#allocation4], 4294967168  ;;  %v29_v0 = vld [vmem:[#allocation3] sm:$0xff]  ;;  %s118_s19 = smov 96   ;;  %s119_s20 = smov 32   ;;  %vm37_vm0 = vcmask 261120   ;;  %v35_v10 = vlaneseq  ;;  %v77_v18 = vstv %s155_s2 }
   0x5   :  { %v90_v1 = vld [vmem:[%s154_s1] ss:$0 sm:$0xff]  ;;  %s120_s21 = smov 64   ;;  %vm79_vm5 = vcmask 31744  }
   0x6   :  { %v34_v2 = vmul.f32 %v90_v1, %v29_v0  ;;  %v36_v11 = vand.u32 127, %v35_v10 }
   0x8   :  { %46 = vrot.lane.b32.xlu0 %v34_v2, %s118_s19  ;;  %66 = vrot.lane.b32.xlu1 %v34_v2, %s119_s20  ;;  %v38_v3 = vsel %vm37_vm0, %v34_v2, 0.0  ;;  %vm41_vm1 = vcmp.eq.s32.totalorder %v36_v11, 0  ;;  %vm52_vm2 = vcmp.eq.s32.totalorder %v36_v11, 1  ;;  %vm62_vm3 = vcmp.eq.s32.totalorder %v36_v11, 2 }
   0x9   :  { %vm72_vm4 = vcmp.eq.s32.totalorder %v36_v11, 3 }
  0x10   :  { %56 = vrot.lane.b32.xlu0 %v34_v2, %s120_s21 }
  0x32   :  { %39 = vadd.xlane.f32.xlu1 %v38_v3 }
  0x7a   :  { %v47_v4 = vpop.permute.xlu0 %46  ;;  %v67_v5 = vpop.permute.xlu1 %66 }
  0x7b   :  { %v49_v6 = vsel %vm37_vm0, %v47_v4, 0.0  ;;  %v69_v7 = vsel %vm37_vm0, %v67_v5, 0.0 }
  0x7c   :  { %50 = vadd.xlane.f32.xlu2 %v49_v6  ;;  %70 = vadd.xlane.f32.xlu0 %v69_v7 }
  0x82   :  { %v57_v8 = vpop.permute.xlu0 %56 }
  0x83   :  { %v59_v9 = vsel %vm37_vm0, %v57_v8, 0.0 }
  0x84   :  { %60 = vadd.xlane.f32.xlu2 %v59_v9 }
  0xa5   :  { %v40_v13 = vpop.xlane.xlu1 %39 }
  0xa6   :  { %v44_v14 = vsel %vm41_vm1, %v40_v13, 0.0 }
  0xef   :  { %v51_v12 = vpop.xlane.xlu2 %50  ;;  %v71_v15 = vpop.xlane.xlu0 %70 }
  0xf0   :  { %v55_v16 = vsel %vm52_vm2, %v51_v12, %v44_v14 }
  0xf7   :  { %v61_v17 = vpop.xlane.xlu2 %60 }
  0xf8   :  { %v65_v19 = vsel %vm62_vm3, %v61_v17, %v55_v16 }
  0xf9   :  { %v75_v20 = vsel %vm72_vm4, %v71_v15, %v65_v19 }
  0xfa   :  { %v78_v21 = vadd.f32 %v77_v18, %v75_v20 }
  0xfc   :  { %80 = vst.msk [vmem:[%s156_s3] sm:$0xff] %vm79_vm5, %v78_v21 }
  0xfd   :  { %85 = vsyncpa [#allocation4], 1 }

</bundles_post_ra>
